<compile_context>
chip_gen: v5e
topology: v5e:2x2
jax: 0.10.0
libtpu: 0.0.40
codegen_flags: <defaults>
</compile_context>

<pallas_src>
import functools

import jax
import jax.numpy as jnp
from jax import lax
from jax.experimental import pallas as pl
from jax.experimental.pallas import tpu as pltpu

EPS = 1e-5
LANE = 128


def _pad_to(a, axis, mult):
    size = a.shape[axis]
    pad = (-size) % mult
    if pad == 0:
        return a
    widths = [(0, 0)] * a.ndim
    widths[axis] = (0, pad)
    return jnp.pad(a, widths)


def _vmem_budget_bytes():
    """Generation-aware VMEM budget with headroom for Mosaic-internal scratch."""
    try:
        cap = int(pltpu.get_tpu_info().vmem_capacity_bytes)
    except Exception:
        cap = 64 << 20  # conservative (v7x-sized) fallback
    return min(int(cap * 0.75), 96 << 20)


def _usage_bytes(batch, in_p, tile_h, out_p, n_buf_w):
    f = 4  # f32
    return f * (
        2 * batch * in_p           # resident x block (double-buffer worst case)
        + n_buf_w * in_p * tile_h  # streamed w1 tiles
        + n_buf_w * 2 * tile_h     # streamed [gamma1; beta1] tiles
        + n_buf_w * tile_h * out_p # streamed w2 tiles
        + 2 * 2 * out_p            # resident [gamma2; beta2]
        + 2 * batch * out_p        # output block
        + batch * out_p            # f32 accumulator scratch
        + 2 * batch * tile_h       # in-kernel h intermediate headroom
    )


def _select_tile_h(batch, in_p, hidden_p, out_p, budget):
    """Largest 128-multiple divisor of hidden_p whose working set fits the budget."""
    t = hidden_p
    while t >= LANE:
        if hidden_p % t == 0:
            n_h = hidden_p // t
            n_buf = 3 if n_h >= 3 else 2
            if _usage_bytes(batch, in_p, t, out_p, n_buf) <= budget:
                return t
        t -= LANE
    return LANE  # last resort; see batch-split TODO above


def _spec(shape, index_map, buffered=None):
    if buffered is None:
        return pl.BlockSpec(shape, index_map)
    try:
        return pl.BlockSpec(shape, index_map, pipeline_mode=pl.Buffered(buffered))
    except TypeError:  # older jax without pipeline_mode: fall back to default depth
        return pl.BlockSpec(shape, index_map)


# ---- fused kernel: per hidden tile k:
#      Linear1 -> BN1(train) -> ReLU -> accumulate into Linear2; BN2 + store at last k.
def _fused_kernel(x_ref, w1_ref, bn1_ref, w2_ref, bn2_ref, o_ref, acc_ref):
    k = pl.program_id(0)

    @pl.when(k == 0)
    def _():
        acc_ref[...] = jnp.zeros_like(acc_ref)

    # Linear1 (f32 operands, f32 accumulation on the MXU)
    h = jnp.dot(x_ref[...], w1_ref[...], preferred_element_type=jnp.float32)

    # BN1 with per-batch statistics (per-feature over the batch -> tile-independent)
    mean1 = jnp.mean(h, axis=0, keepdims=True)
    hc = h - mean1
    var1 = jnp.mean(hc * hc, axis=0, keepdims=True)
    bn1 = bn1_ref[...]
    scale1 = bn1[0:1, :] * lax.rsqrt(var1 + EPS)      # gamma folded into the scale
    h = jnp.maximum(hc * scale1 + bn1[1:2, :], 0.0)    # ReLU

    # Linear2 partial product for this hidden tile
    acc_ref[...] += jnp.dot(h, w2_ref[...], preferred_element_type=jnp.float32)

    @pl.when(k == pl.num_programs(0) - 1)
    def _():
        y = acc_ref[...]
        mean2 = jnp.mean(y, axis=0, keepdims=True)
        yc = y - mean2
        var2 = jnp.mean(yc * yc, axis=0, keepdims=True)
        bn2 = bn2_ref[...]
        scale2 = bn2[0:1, :] * lax.rsqrt(var2 + EPS)
        o_ref[...] = (yc * scale2 + bn2[1:2, :]).astype(o_ref.dtype)


@functools.partial(jax.jit, static_argnames=())
def embedding_transform(x, w1, b1, g1, beta1, w2, b2, g2, beta2):
    # Dropout -> identity (eval).  b1/b2 cancel through training-mode BN mean subtraction.
    del b1, b2
    batch, in_size = x.shape
    hidden = w1.shape[1]
    out_size = w2.shape[1]

    # Lane-dense padding of all feature axes (zero pad is exact: padded gamma/beta/weight
    # columns are zero, so padded outputs are zero and are sliced off below).
    x_p = _pad_to(x.astype(jnp.float32), 1, LANE)
    w1_p = _pad_to(_pad_to(w1.astype(jnp.float32), 0, LANE), 1, LANE)
    w2_p = _pad_to(_pad_to(w2.astype(jnp.float32), 0, LANE), 1, LANE)
    bn1 = jnp.concatenate([g1.reshape(1, hidden), beta1.reshape(1, hidden)], axis=0)
    bn2 = jnp.concatenate([g2.reshape(1, out_size), beta2.reshape(1, out_size)], axis=0)
    bn1_p = _pad_to(bn1.astype(jnp.float32), 1, LANE)
    bn2_p = _pad_to(bn2.astype(jnp.float32), 1, LANE)

    in_p = x_p.shape[1]
    hidden_p = w1_p.shape[1]
    out_p = w2_p.shape[1]

    budget = _vmem_budget_bytes()
    tile_h = _select_tile_h(batch, in_p, hidden_p, out_p, budget)
    n_h = hidden_p // tile_h
    w_depth = 3 if n_h >= 3 else None   # deeper buffering only pays on long reductions

    cost = pl.CostEstimate(
        flops=2 * batch * in_p * hidden_p + 2 * batch * hidden_p * out_p
              + 10 * batch * (hidden_p + out_p),
        transcendentals=0,
        bytes_accessed=4 * (batch * in_p + in_p * hidden_p + hidden_p * out_p
                            + 2 * (hidden_p + out_p) + batch * out_p),
    )

    out_p_arr = pl.pallas_call(
        _fused_kernel,
        out_shape=jax.ShapeDtypeStruct((batch, out_p), jnp.float32),
        grid_spec=pltpu.PrefetchScalarGridSpec(
            num_scalar_prefetch=0,
            grid=(n_h,),
            in_specs=[
                pl.BlockSpec((batch, in_p), lambda k: (0, 0)),          # x, batch-resident
                _spec((in_p, tile_h), lambda k: (0, k), w_depth),       # w1 tile (streamed)
                pl.BlockSpec((2, tile_h), lambda k: (0, k)),            # [gamma1; beta1] tile
                _spec((tile_h, out_p), lambda k: (k, 0), w_depth),      # w2 tile (streamed)
                pl.BlockSpec((2, out_p), lambda k: (0, 0)),             # [gamma2; beta2]
            ],
            out_specs=pl.BlockSpec((batch, out_p), lambda k: (0, 0)),   # resident output
            scratch_shapes=[pltpu.VMEM((batch, out_p), jnp.float32)],   # Linear2 accumulator
        ),
        compiler_params=pltpu.CompilerParams(
            dimension_semantics=("arbitrary",),       # hidden axis is a reduction
            vmem_limit_bytes=budget,
        ),
        cost_estimate=cost,
    )(x_p, w1_p, bn1_p, w2_p, bn2_p)

    return out_p_arr[:, :out_size]


def reference(x, w1, b1, g1, beta1, w2, b2, g2, beta2):
    # Pure-JAX reference WITH the biases (they cancel through training-mode BN).
    h = x @ w1 + b1
    m = h.mean(0, keepdims=True)
    v = ((h - m) ** 2).mean(0, keepdims=True)
    h = (h - m) / jnp.sqrt(v + EPS) * g1 + beta1
    h = jnp.maximum(h, 0.0)
    y = h @ w2 + b2
    m = y.mean(0, keepdims=True)
    v = ((y - m) ** 2).mean(0, keepdims=True)
    return (y - m) / jnp.sqrt(v + EPS) * g2 + beta2


if __name__ == "__main__":
    # Small shapes consistent with the module's forward.
    batch, input_size, hidden_size, out_size = 8, 32, 64, 16

    key = jax.random.PRNGKey(0)
    kx, kw1, kb1, kw2, kb2, kg1, kbe1, kg2, kbe2 = jax.random.split(key, 9)

    x = jax.random.normal(kx, (batch, input_size), dtype=jnp.float32)

    # Linear weights stored pre-transposed as (in, out) == torch weight.T
    w1 = jax.random.normal(kw1, (input_size, hidden_size), jnp.float32) / jnp.sqrt(input_size)
    b1 = jax.random.normal(kb1, (1, hidden_size), jnp.float32) * 0.02
    g1 = 1.0 + 0.1 * jax.random.normal(kg1, (1, hidden_size), jnp.float32)
    beta1 = 0.1 * jax.random.normal(kbe1, (1, hidden_size), jnp.float32)

    w2 = jax.random.normal(kw2, (hidden_size, out_size), jnp.float32) / jnp.sqrt(hidden_size)
    b2 = jax.random.normal(kb2, (1, out_size), jnp.float32) * 0.02
    g2 = 1.0 + 0.1 * jax.random.normal(kg2, (1, out_size), jnp.float32)
    beta2 = 0.1 * jax.random.normal(kbe2, (1, out_size), jnp.float32)

    out = embedding_transform(x, w1, b1, g1, beta1, w2, b2, g2, beta2)
    out = jax.block_until_ready(out)

    ref = reference(x, w1, b1, g1, beta1, w2, b2, g2, beta2)
    assert out.shape == (batch, out_size)
    assert jnp.allclose(out, ref, atol=1e-4, rtol=1e-4), "mismatch vs reference"

    print("KERNEL_OK")
</pallas_src>

<mosaic_0001>
module attributes {stable_mosaic.version = 11 : i64} {
  func.func @_fused_kernel(%arg0: i32, %arg1: memref<8x128xf32, #tpu.memory_space<vmem>>, %arg2: memref<128x128xf32, #tpu.memory_space<vmem>>, %arg3: memref<2x128xf32, #tpu.memory_space<vmem>>, %arg4: memref<128x128xf32, #tpu.memory_space<vmem>>, %arg5: memref<2x128xf32, #tpu.memory_space<vmem>>, %arg6: memref<8x128xf32, #tpu.memory_space<vmem>>, %arg7: memref<8x128xf32, #tpu.memory_space<vmem>>) attributes {dimension_semantics = [#tpu.dimension_semantics<arbitrary>], iteration_bounds = array<i64: 1>, scalar_prefetch = 0 : i64, scratch_operands = 1 : i64, tpu.core_type = #tpu.core_type<tc>, window_params = [{pipeline_mode = #tpu.pipeline_mode<synchronous>, transform_indices = @transform_0, window_bounds = array<i64: 8, 128>}, {transform_indices = @transform_1, window_bounds = array<i64: 128, 128>}, {transform_indices = @transform_2, window_bounds = array<i64: 2, 128>}, {transform_indices = @transform_3, window_bounds = array<i64: 128, 128>}, {pipeline_mode = #tpu.pipeline_mode<synchronous>, transform_indices = @transform_4, window_bounds = array<i64: 2, 128>}, {pipeline_mode = #tpu.pipeline_mode<synchronous>, transform_indices = @transform_5, window_bounds = array<i64: 8, 128>}]} {
    %c0_i32 = arith.constant 0 : i32
    %0 = arith.cmpi eq, %arg0, %c0_i32 : i32
    %1 = arith.extui %0 : i1 to i32
    %c0_i32_0 = arith.constant 0 : i32
    %2 = arith.cmpi ne, %1, %c0_i32_0 : i32
    scf.if %2 {
      %cst_21 = arith.constant 0.000000e+00 : f32
      %38 = vector.broadcast %cst_21 : f32 to vector<8x128xf32>
      %c0_22 = arith.constant 0 : index
      %c0_23 = arith.constant 0 : index
      %39 = vector.load %arg7[%c0_22, %c0_23] : memref<8x128xf32, #tpu.memory_space<vmem>>, vector<8x128xf32>
      tpu.vector_store %arg7[%c0_22, %c0_23], %38 {strides = array<i32>} : memref<8x128xf32, #tpu.memory_space<vmem>>, vector<8x128xf32>,
    } else {
    }
    %c0 = arith.constant 0 : index
    %c0_1 = arith.constant 0 : index
    %3 = vector.load %arg1[%c0, %c0_1] : memref<8x128xf32, #tpu.memory_space<vmem>>, vector<8x128xf32>
    %c0_2 = arith.constant 0 : index
    %c0_3 = arith.constant 0 : index
    %4 = vector.load %arg2[%c0_2, %c0_3] : memref<128x128xf32, #tpu.memory_space<vmem>>, vector<128x128xf32>
    %cst = arith.constant dense<0.000000e+00> : vector<8x128xf32>
    %5 = tpu.matmul %3, %4, %cst {dimension_numbers = #tpu.dot_dimension_numbers<[1], [0], [0], [1], [0, 0, 1, 1], [], []>} : vector<8x128xf32>, vector<128x128xf32>, vector<8x128xf32> -> vector<8x128xf32>
    %cst_4 = arith.constant dense<0.000000e+00> : vector<128xf32>
    %6 = vector.multi_reduction <add>, %5, %cst_4 [0] : vector<8x128xf32> to vector<128xf32>
    %7 = vector.shape_cast %6 : vector<128xf32> to vector<1x128xf32>
    %cst_5 = arith.constant 8.000000e+00 : f32
    %8 = vector.broadcast %cst_5 : f32 to vector<1x128xf32>
    %9 = arith.divf %7, %8 : vector<1x128xf32>
    %10 = vector.broadcast %9 : vector<1x128xf32> to vector<8x128xf32>
    %11 = arith.subf %5, %10 : vector<8x128xf32>
    %12 = arith.mulf %11, %11 : vector<8x128xf32>
    %cst_6 = arith.constant dense<0.000000e+00> : vector<128xf32>
    %13 = vector.multi_reduction <add>, %12, %cst_6 [0] : vector<8x128xf32> to vector<128xf32>
    %14 = vector.shape_cast %13 : vector<128xf32> to vector<1x128xf32>
    %cst_7 = arith.constant 8.000000e+00 : f32
    %15 = vector.broadcast %cst_7 : f32 to vector<1x128xf32>
    %16 = arith.divf %14, %15 : vector<1x128xf32>
    %c0_8 = arith.constant 0 : index
    %c0_9 = arith.constant 0 : index
    %17 = vector.load %arg3[%c0_8, %c0_9] : memref<2x128xf32, #tpu.memory_space<vmem>>, vector<2x128xf32>
    %18 = vector.extract_strided_slice %17 {offsets = [0, 0], sizes = [1, 128], strides = [1, 1]} : vector<2x128xf32> to vector<1x128xf32>
    %cst_10 = arith.constant 9.99999974E-6 : f32
    %19 = vector.broadcast %cst_10 : f32 to vector<1x128xf32>
    %20 = arith.addf %16, %19 : vector<1x128xf32>
    %21 = math.rsqrt %20 : vector<1x128xf32>
    %22 = arith.mulf %18, %21 : vector<1x128xf32>
    %23 = vector.broadcast %22 : vector<1x128xf32> to vector<8x128xf32>
    %24 = arith.mulf %11, %23 : vector<8x128xf32>
    %25 = vector.extract_strided_slice %17 {offsets = [1, 0], sizes = [1, 128], strides = [1, 1]} : vector<2x128xf32> to vector<1x128xf32>
    %26 = vector.broadcast %25 : vector<1x128xf32> to vector<8x128xf32>
    %27 = arith.addf %24, %26 : vector<8x128xf32>
    %cst_11 = arith.constant 0.000000e+00 : f32
    %28 = vector.broadcast %cst_11 : f32 to vector<8x128xf32>
    %29 = arith.maximumf %27, %28 : vector<8x128xf32>
    %c0_12 = arith.constant 0 : index
    %c0_13 = arith.constant 0 : index
    %30 = vector.load %arg7[%c0_12, %c0_13] : memref<8x128xf32, #tpu.memory_space<vmem>>, vector<8x128xf32>
    %c0_14 = arith.constant 0 : index
    %c0_15 = arith.constant 0 : index
    %31 = vector.load %arg4[%c0_14, %c0_15] : memref<128x128xf32, #tpu.memory_space<vmem>>, vector<128x128xf32>
    %cst_16 = arith.constant dense<0.000000e+00> : vector<8x128xf32>
    %32 = tpu.matmul %29, %31, %cst_16 {dimension_numbers = #tpu.dot_dimension_numbers<[1], [0], [0], [1], [0, 0, 1, 1], [], []>} : vector<8x128xf32>, vector<128x128xf32>, vector<8x128xf32> -> vector<8x128xf32>
    %33 = arith.addf %30, %32 : vector<8x128xf32>
    %c0_17 = arith.constant 0 : index
    %c0_18 = arith.constant 0 : index
    %34 = vector.load %arg7[%c0_17, %c0_18] : memref<8x128xf32, #tpu.memory_space<vmem>>, vector<8x128xf32>
    tpu.vector_store %arg7[%c0_17, %c0_18], %33 {strides = array<i32>} : memref<8x128xf32, #tpu.memory_space<vmem>>, vector<8x128xf32>,
    %c0_i32_19 = arith.constant 0 : i32
    %35 = arith.cmpi eq, %arg0, %c0_i32_19 : i32
    %36 = arith.extui %35 : i1 to i32
    %c0_i32_20 = arith.constant 0 : i32
    %37 = arith.cmpi ne, %36, %c0_i32_20 : i32
    scf.if %37 {
      %c0_21 = arith.constant 0 : index
      %c0_22 = arith.constant 0 : index
      %38 = vector.load %arg7[%c0_21, %c0_22] : memref<8x128xf32, #tpu.memory_space<vmem>>, vector<8x128xf32>
      %cst_23 = arith.constant dense<0.000000e+00> : vector<128xf32>
      %39 = vector.multi_reduction <add>, %38, %cst_23 [0] : vector<8x128xf32> to vector<128xf32>
      %40 = vector.shape_cast %39 : vector<128xf32> to vector<1x128xf32>
      %cst_24 = arith.constant 8.000000e+00 : f32
      %41 = vector.broadcast %cst_24 : f32 to vector<1x128xf32>
      %42 = arith.divf %40, %41 : vector<1x128xf32>
      %43 = vector.broadcast %42 : vector<1x128xf32> to vector<8x128xf32>
      %44 = arith.subf %38, %43 : vector<8x128xf32>
      %45 = arith.mulf %44, %44 : vector<8x128xf32>
      %cst_25 = arith.constant dense<0.000000e+00> : vector<128xf32>
      %46 = vector.multi_reduction <add>, %45, %cst_25 [0] : vector<8x128xf32> to vector<128xf32>
      %47 = vector.shape_cast %46 : vector<128xf32> to vector<1x128xf32>
      %cst_26 = arith.constant 8.000000e+00 : f32
      %48 = vector.broadcast %cst_26 : f32 to vector<1x128xf32>
      %49 = arith.divf %47, %48 : vector<1x128xf32>
      %c0_27 = arith.constant 0 : index
      %c0_28 = arith.constant 0 : index
      %50 = vector.load %arg5[%c0_27, %c0_28] : memref<2x128xf32, #tpu.memory_space<vmem>>, vector<2x128xf32>
      %51 = vector.extract_strided_slice %50 {offsets = [0, 0], sizes = [1, 128], strides = [1, 1]} : vector<2x128xf32> to vector<1x128xf32>
      %cst_29 = arith.constant 9.99999974E-6 : f32
      %52 = vector.broadcast %cst_29 : f32 to vector<1x128xf32>
      %53 = arith.addf %49, %52 : vector<1x128xf32>
      %54 = math.rsqrt %53 : vector<1x128xf32>
      %55 = arith.mulf %51, %54 : vector<1x128xf32>
      %56 = vector.broadcast %55 : vector<1x128xf32> to vector<8x128xf32>
      %57 = arith.mulf %44, %56 : vector<8x128xf32>
      %58 = vector.extract_strided_slice %50 {offsets = [1, 0], sizes = [1, 128], strides = [1, 1]} : vector<2x128xf32> to vector<1x128xf32>
      %59 = vector.broadcast %58 : vector<1x128xf32> to vector<8x128xf32>
      %60 = arith.addf %57, %59 : vector<8x128xf32>
      %c0_30 = arith.constant 0 : index
      %c0_31 = arith.constant 0 : index
      %61 = vector.load %arg6[%c0_30, %c0_31] : memref<8x128xf32, #tpu.memory_space<vmem>>, vector<8x128xf32>
      tpu.vector_store %arg6[%c0_30, %c0_31], %60 {strides = array<i32>} : memref<8x128xf32, #tpu.memory_space<vmem>>, vector<8x128xf32>,
    } else {
    }
    return
  }
  func.func @transform_0(%arg0: i32) -> (i32, i32) {
    %c0_i32 = arith.constant 0 : i32
    %c0_i32_0 = arith.constant 0 : i32
    %c0_i32_1 = arith.constant 0 : i32
    return %c0_i32, %c0_i32_0 : i32, i32
  }
  func.func @transform_1(%arg0: i32) -> (i32, i32) {
    %c0_i32 = arith.constant 0 : i32
    %c0_i32_0 = arith.constant 0 : i32
    return %c0_i32, %arg0 : i32, i32
  }
  func.func @transform_2(%arg0: i32) -> (i32, i32) {
    %c0_i32 = arith.constant 0 : i32
    %c0_i32_0 = arith.constant 0 : i32
    return %c0_i32, %arg0 : i32, i32
  }
  func.func @transform_3(%arg0: i32) -> (i32, i32) {
    %c0_i32 = arith.constant 0 : i32
    %c0_i32_0 = arith.constant 0 : i32
    return %arg0, %c0_i32 : i32, i32
  }
  func.func @transform_4(%arg0: i32) -> (i32, i32) {
    %c0_i32 = arith.constant 0 : i32
    %c0_i32_0 = arith.constant 0 : i32
    %c0_i32_1 = arith.constant 0 : i32
    return %c0_i32, %c0_i32_0 : i32, i32
  }
  func.func @transform_5(%arg0: i32) -> (i32, i32) {
    %c0_i32 = arith.constant 0 : i32
    %c0_i32_0 = arith.constant 0 : i32
    %c0_i32_1 = arith.constant 0 : i32
    return %c0_i32, %c0_i32_0 : i32, i32
  }
}

</mosaic_0001>

<bundles_post_ra>
// kernel: embedding_transform.1
= control target key start
LH: loop header
LB: loop body
LE: loop exit
PB: predicated region body
PF: predicated region fallthrough
CT: control target
= control target key end

     0   :  { %s377_s0 = inlined_call_operand.vmem [shape: f32[8,128], index: 0, kind: input, shape index: {}]   ;;  %s378_s1 = inlined_call_operand.vmem [shape: f32[128,128], index: 1, kind: input, shape index: {}]   ;;  %s379_s2 = inlined_call_operand.vmem [shape: f32[2,128], index: 2, kind: input, shape index: {}]   ;;  %s380_s3 = inlined_call_operand.vmem [shape: f32[128,128], index: 3, kind: input, shape index: {}]   ;;  %s381_s4 = inlined_call_operand.vmem [shape: f32[2,128], index: 4, kind: input, shape index: {}]   ;;  %s382_s5 = inlined_call_operand.hbm [shape: f32[8,128], index: 5, kind: output, shape index: {}]  }
   0x1   :  { %v42_v0 = vld [vmem:[%s378_s1 + $0x78] sm:$0xff]  ;;  %v41_v1 = vld [vmem:[%s378_s1 + $0x70] sm:$0xff]  ;;  %v40_v2 = vld [vmem:[%s378_s1 + $0x68] sm:$0xff] }
   0x2   :  { %43 = vmatpush.msra.mxu0 %v42_v0  ;;  %v39_v3 = vld [vmem:[%s378_s1 + $0x60] sm:$0xff] }
   0x4   :  { %44 = vmatpush.msra.mxu0 %v41_v1 }
   0x6   :  { %45 = vmatpush.msra.mxu0 %v40_v2 }
   0x7   :  { %10 = vsyncpa [#allocation4], 0  ;;  %v38_v4 = vld [vmem:[%s378_s1 + $0x58] sm:$0xff]  ;;  %v37_v5 = vld [vmem:[%s378_s1 + $0x50] sm:$0xff]  ;;  %v231_v17 = vmov 8.0   ;;  %s232_s7 = smov [#allocation3]  }
   0x8   :  { %46 = vmatpush.msra.mxu0 %v39_v3  ;;  %v36_v6 = vld [vmem:[%s378_s1 + $0x48] sm:$0xff]  ;;  %v35_v7 = vld [vmem:[%s378_s1 + $0x40] sm:$0xff]  ;;  %v34_v8 = vld [vmem:[%s378_s1 + $0x38] sm:$0xff]  ;;  %199 = vrcp.f32 %v231_v17  ;;  %s186_s8 = sshll.u32 %s232_s7, 4  ;;  %s188_s11 = sshll.u32 %s382_s5, 4  ;;  %s187_s8 = int_to_ptr.vmem [resolvable:$true] %s186_s8  ;;  %s189_s11 = int_to_ptr.hbm [resolvable:$true] %s188_s11 }
   0x9   :  { %v33_v9 = vld [vmem:[%s378_s1 + $0x30] sm:$0xff]  ;;  %v32_v10 = vld [vmem:[%s378_s1 + $0x28] sm:$0xff]  ;;  %v31_v11 = vld [vmem:[%s378_s1 + $0x20] sm:$0xff] }
   0xa   :  { %47 = vmatpush.msra.mxu0 %v38_v4  ;;  %v30_v12 = vld [vmem:[%s378_s1 + $0x18] sm:$0xff]  ;;  %v29_v13 = vld [vmem:[%s378_s1 + $0x10] sm:$0xff]  ;;  %v28_v14 = vld [vmem:[%s378_s1 + $0x8] sm:$0xff] }
   0xb   :  { %v27_v15 = vld [vmem:[%s378_s1] sm:$0xff]  ;;  %v120_v21 = vld [vmem:[%s380_s3 + $0x78] sm:$0xff]  ;;  %v119_v24 = vld [vmem:[%s380_s3 + $0x70] sm:$0xff] }
   0xc   :  { %48 = vmatpush.msra.mxu0 %v37_v5  ;;  %v26_v16 = vld [vmem:[%s377_s0] sm:$0xff]  ;;  %121 = vmatpush.msra.mxu1 %v120_v21  ;;  %v118_v27 = vld [vmem:[%s380_s3 + $0x68] sm:$0xff]  ;;  %v116_v32 = vld [vmem:[%s380_s3 + $0x58] sm:$0xff] }
   0xd   :  { %v117_v29 = vld [vmem:[%s380_s3 + $0x60] sm:$0xff]  ;;  %v115_v34 = vld [vmem:[%s380_s3 + $0x50] sm:$0xff]  ;;  %v114_v37 = vld [vmem:[%s380_s3 + $0x48] sm:$0xff] }
   0xe   :  { %49 = vmatpush.msra.mxu0 %v36_v6  ;;  %v200_v18 = vpop.eup %199  ;;  %122 = vmatpush.msra.mxu1 %v119_v24  ;;  %v113_v39 = vld [vmem:[%s380_s3 + $0x40] sm:$0xff]  ;;  %v112_v41 = vld [vmem:[%s380_s3 + $0x38] sm:$0xff]  ;;  %v111_v43 = vld [vmem:[%s380_s3 + $0x30] sm:$0xff] }
   0xf   :  { %v70_v19 = vmul.f32 8.0, %v200_v18  ;;  %vm74_vm0 = vweird.f32 %v200_v18  ;;  %v110_v45 = vld [vmem:[%s380_s3 + $0x28] sm:$0xff]  ;;  %v109_v47 = vld [vmem:[%s380_s3 + $0x20] sm:$0xff]  ;;  %v108_v49 = vld [vmem:[%s380_s3 + $0x18] sm:$0xff] }
  0x10   :  { %50 = vmatpush.msra.mxu0 %v35_v7  ;;  %123 = vmatpush.msra.mxu1 %v118_v27  ;;  %v107_v51 = vld [vmem:[%s380_s3 + $0x10] sm:$0xff]  ;;  %v106_v52 = vld [vmem:[%s380_s3 + $0x8] sm:$0xff]  ;;  %v105_v54 = vld [vmem:[%s380_s3] sm:$0xff] }
  0x11   :  { %v71_v20 = vsub.f32 1.0, %v70_v19  ;;  %v86_v63 = vld [vmem:[%s379_s2] sm:$0x3] }
  0x12   :  { %51 = vmatpush.msra.mxu0 %v34_v8  ;;  %124 = vmatpush.msra.mxu1 %v117_v29  ;;  %v101_v4 = vperm.slane %v86_v63, 1 }
  0x13   :  { %v72_v25 = vmul.f32 %v200_v18, %v71_v20 }
  0x14   :  { %52 = vmatpush.msra.mxu0 %v33_v9  ;;  %125 = vmatpush.msra.mxu1 %v116_v32 }
  0x15   :  { %v73_v30 = vadd.f32 %v200_v18, %v72_v25 }
  0x16   :  { %53 = vmatpush.msra.mxu0 %v32_v10  ;;  %126 = vmatpush.msra.mxu1 %v115_v34 }
  0x17   :  { %v332_v35 = vsel %vm74_vm0, %v200_v18, %v73_v30 }
  0x18   :  { %54 = vmatpush.msra.mxu0 %v31_v11  ;;  %127 = vmatpush.msra.mxu1 %v114_v37 }
  0x1a   :  { %55 = vmatpush.msra.mxu0 %v30_v12  ;;  %128 = vmatpush.msra.mxu1 %v113_v39 }
  0x1c   :  { %56 = vmatpush.msra.mxu0 %v29_v13  ;;  %129 = vmatpush.msra.mxu1 %v112_v41 }
  0x1e   :  { %57 = vmatpush.msra.mxu0 %v28_v14  ;;  %130 = vmatpush.msra.mxu1 %v111_v43 }
  0x20   :  { %58 = vmatpush.msra.mxu0 %v27_v15  ;;  %131 = vmatpush.msra.mxu1 %v110_v45 }
  0x21   :  { %59 = vmatmul.f32.vlgmr.msra.gmra.mxu0 %v26_v16 }
  0x22   :  { %132 = vmatpush.msra.mxu1 %v109_v47 }
  0x24   :  { %133 = vmatpush.msra.mxu1 %v108_v49 }
  0x26   :  { %134 = vmatpush.msra.mxu1 %v107_v51 }
  0x28   :  { %135 = vmatpush.msra.mxu1 %v106_v52 }
  0x2a   :  { %136 = vmatpush.msra.mxu1 %v105_v54 }
  0x9e   :  { %v60_v22 = vpop.f32.mrf.mxu0 }
  0x9f   :  { %v63_v23 = vrot.slane %v60_v22, 4 }
  0xa1   :  { %v64_v26 = vadd.f32 %v63_v23, %v60_v22 }
  0xa3   :  { %v65_v28 = vrot.slane %v64_v26, 2 }
  0xa5   :  { %v66_v31 = vadd.f32 %v65_v28, %v64_v26 }
  0xa7   :  { %v67_v33 = vrot.slane %v66_v31, 1 }
  0xa9   :  { %v68_v36 = vadd.f32 %v67_v33, %v66_v31  ;;  %v163_v31 = vld [vmem:[%s381_s4] sm:$0x3] }
  0xaa   :  { %v178_v37 = vperm.slane %v163_v31, 1 }
  0xab   :  { %v76_v38 = vmul.f32 %v332_v35, %v68_v36 }
  0xad   :  { %v77_v40 = vsub.f32 %v60_v22, %v76_v38 }
  0xaf   :  { %v78_v42 = vmul.f32 %v77_v40, %v77_v40 }
  0xb1   :  { %v79_v44 = vrot.slane %v78_v42, 4 }
  0xb3   :  { %v80_v46 = vadd.f32 %v79_v44, %v78_v42 }
  0xb5   :  { %v81_v48 = vrot.slane %v80_v46, 2 }
  0xb7   :  { %v82_v50 = vadd.f32 %v81_v48, %v80_v46 }
  0xb9   :  { %v83_v53 = vrot.slane %v82_v50, 1 }
  0xbb   :  { %v84_v55 = vadd.f32 %v83_v53, %v82_v50 }
  0xbd   :  { %v85_v56 = vmul.f32 %v84_v55, %v332_v35 }
  0xbf   :  { %v87_v57 = vadd.f32 1e-05, %v85_v56 }
  0xc1   :  { %201 = vrsqrt.f32 %v87_v57  ;;  %vm94_vm2 = vweird.f32 %v87_v57 }
  0xc7   :  { %v202_v58 = vpop.eup %201 }
  0xc8   :  { %v89_v59 = vmul.f32 %v202_v58, %v87_v57  ;;  %vm95_vm1 = vweird.f32 %v202_v58 }
  0xc9   :  { %vm96_vm3 = vmor %vm94_vm2, %vm95_vm1 }
  0xca   :  { %v90_v60 = vmul.f32 %v202_v58, %v89_v59 }
  0xcc   :  { %v91_v61 = vmul.f32 0.5, %v90_v60 }
  0xce   :  { %v92_v62 = vsub.f32 1.5, %v91_v61 }
  0xd0   :  { %v93_v0 = vmul.f32 %v202_v58, %v92_v62 }
  0xd2   :  { %v97_v1 = vsel %vm96_vm3, %v202_v58, %v93_v0 }
  0xd3   :  { %v98_v2 = vmul.f32 %v97_v1, %v86_v63 }
  0xd5   :  { %v99_v3 = vperm.slane %v98_v2, 0 }
  0xd7   :  { %v100_v5 = vmul.f32 %v99_v3, %v77_v40 }
  0xd9   :  { %v102_v6 = vadd.f32 %v101_v4, %v100_v5 }
  0xdb   :  { %v103_v7 = vmax.f32 %v102_v6, 0.0 }
  0xdd   :  { %137 = vmatmul.f32.vlgmr.msra.gmra.mxu1 %v103_v7 }
 0x15a   :  { %v138_v8 = vpop.f32.mrf.mxu1 }
 0x15b   :  { %v147_v9 = vrot.slane %v138_v8, 4 }
 0x15d   :  { %v148_v10 = vadd.f32 %v147_v9, %v138_v8 }
 0x15f   :  { %v149_v11 = vrot.slane %v148_v10, 2 }
 0x161   :  { %v150_v12 = vadd.f32 %v149_v11, %v148_v10 }
 0x163   :  { %v151_v13 = vrot.slane %v150_v12, 1 }
 0x165   :  { %v152_v14 = vadd.f32 %v151_v13, %v150_v12 }
 0x167   :  { %v153_v15 = vmul.f32 %v152_v14, %v332_v35 }
 0x169   :  { %v154_v16 = vsub.f32 %v138_v8, %v153_v15 }
 0x16b   :  { %v155_v17 = vmul.f32 %v154_v16, %v154_v16 }
 0x16d   :  { %v156_v18 = vrot.slane %v155_v17, 4 }
 0x16f   :  { %v157_v19 = vadd.f32 %v156_v18, %v155_v17 }
 0x171   :  { %v158_v20 = vrot.slane %v157_v19, 2 }
 0x173   :  { %v159_v21 = vadd.f32 %v158_v20, %v157_v19 }
 0x175   :  { %v160_v22 = vrot.slane %v159_v21, 1 }
 0x177   :  { %v161_v23 = vadd.f32 %v160_v22, %v159_v21 }
 0x179   :  { %v162_v24 = vmul.f32 %v161_v23, %v332_v35 }
 0x17b   :  { %v164_v25 = vadd.f32 1e-05, %v162_v24 }
 0x17d   :  { %203 = vrsqrt.f32 %v164_v25  ;;  %vm171_vm5 = vweird.f32 %v164_v25 }
 0x183   :  { %v204_v26 = vpop.eup %203 }
 0x184   :  { %v166_v27 = vmul.f32 %v204_v26, %v164_v25  ;;  %vm172_vm4 = vweird.f32 %v204_v26 }
 0x185   :  { %vm173_vm6 = vmor %vm171_vm5, %vm172_vm4 }
 0x186   :  { %v167_v28 = vmul.f32 %v204_v26, %v166_v27 }
 0x188   :  { %v168_v29 = vmul.f32 0.5, %v167_v28 }
 0x18a   :  { %v169_v30 = vsub.f32 1.5, %v168_v29 }
 0x18c   :  { %v170_v32 = vmul.f32 %v204_v26, %v169_v30 }
 0x18e   :  { %v174_v33 = vsel %vm173_vm6, %v204_v26, %v170_v32 }
 0x18f   :  { %v175_v34 = vmul.f32 %v174_v33, %v163_v31 }
 0x191   :  { %v176_v36 = vperm.slane %v175_v34, 0 }
 0x193   :  { %v177_v35 = vmul.f32 %v176_v36, %v154_v16 }
 0x195   :  { %v179_v38 = vadd.f32 %v178_v37, %v177_v35 }
 0x197   :  { %180 = vst [vmem:[#allocation3] sm:$0xff] %v179_v38 }
 0x198   :  { %191 = dma.vmem_to_hbm [thread:$0]  %s187_s8, 128, %s189_s11, [#allocation4]  }
 0x199   :  { %229 = dma.done.wait [#allocation4], 128  }
 0x19a   :  { %230 = vsyncadd [#allocation4], 4294967168 }
 0x19b   :  { %196 = vsyncpa [#allocation4], 1 }

</bundles_post_ra>
